<compile_context>
chip_gen: v7x
topology: tpu7x:2x2x1
jax: 0.10.0
libtpu: 0.0.40
codegen_flags: <defaults>
</compile_context>

<pallas_src>
import jax
import jax.numpy as jnp
from jax.experimental import pallas as pl
from jax.experimental.pallas import tpu as pltpu


def _locked_dropout_kernel(mask_ref, x_ref, o_ref):
    # mask_ref: (bB, 1, H) float32 — per-batch mask, identical for every T tile
    # x_ref / o_ref: (bB, tT, H) tiles of the input / output
    x = x_ref[...]
    m = mask_ref[...]                                  # (bB, 1, H)
    o_ref[...] = (x.astype(jnp.float32) * m).astype(o_ref.dtype)


def _vmem_capacity_bytes() -> int:
    try:
        return int(pltpu.get_tpu_info().vmem_capacity_bytes)
    except Exception:
        return 64 * 1024 * 1024        # v7x per-TC capacity = smallest generation


def _pick_tiles(B: int, T: int, H: int, itemsize: int):
    """Pick (bB, tT) so tiles are large (multi-MiB) but the double-buffered
    footprint (2 arrays x 2 buffers x tile) stays under a per-generation budget."""
    budget = min(_vmem_capacity_bytes() // 4, 24 * 1024 * 1024)
    max_tile_bytes = max(budget // 4, 1)               # per-tile bound
    row_bytes = T * H * itemsize                       # one (1, T, H) slab

    if row_bytes <= max_tile_bytes:
        # Full T per block; span as many batch rows as fit.
        bB = max(1, min(B, max_tile_bytes // row_bytes))
        return bB, T
    # One batch row per block; tile T (keep sublane dim a multiple of 8).
    tT = max_tile_bytes // (H * itemsize)
    tT = max(8, (tT // 8) * 8)
    return 1, min(T, tT)


def locked_dropout(x, p: float, key=None, training: bool = True,
                   donate_x: bool = False):
    """LockedDropout forward. x: (B, T, H)."""
    if (not training) or p == 0.0:
        return x
    if key is None:
        raise ValueError("locked_dropout requires an explicit PRNG key in training mode")

    B, T, H = x.shape
    keep_prob = 1.0 - p

    # (B, 1, H) mask: bernoulli(1-p) / (1-p), locked (shared) across the T axis.
    mask = (
        jax.random.bernoulli(key, keep_prob, (B, 1, H)).astype(jnp.float32)
        * jnp.float32(1.0 / keep_prob)
    )

    itemsize = jnp.dtype(x.dtype).itemsize
    bB, tT = _pick_tiles(B, T, H, itemsize)
    grid = (pl.cdiv(B, bB), pl.cdiv(T, tT))

    # Pure streaming op: tell XLA it is cheap and bandwidth-bound.
    cost = pl.CostEstimate(
        flops=B * T * H,
        transcendentals=0,
        bytes_accessed=2 * B * T * H * itemsize + B * H * 4,
    )

    # NOTE: if H were small / not a multiple of 128, folding T-rows into the
    # lane axis wrapper-side would keep stores lane-dense; irrelevant for the
    # common H in {128, 512, 768, 1024, ...}.
    # TODO(synk): on v7x, switch the leading grid axis to pltpu.CORE_PARALLEL
    # (or pl.core_map) to engage both TensorCores; plain "parallel" is a no-op
    # there but is the portable choice for single-TC v5e/v6e.
    return pl.pallas_call(
        _locked_dropout_kernel,
        out_shape=jax.ShapeDtypeStruct((B, T, H), x.dtype),
        grid_spec=pltpu.PrefetchScalarGridSpec(
            num_scalar_prefetch=0,
            grid=grid,
            in_specs=[
                pl.BlockSpec((bB, 1, H), lambda b, t: (b, 0, 0)),    # mask
                pl.BlockSpec((bB, tT, H), lambda b, t: (b, t, 0)),   # x
            ],
            out_specs=pl.BlockSpec((bB, tT, H), lambda b, t: (b, t, 0)),
        ),
        compiler_params=pltpu.CompilerParams(
            dimension_semantics=("parallel", "parallel"),
            vmem_limit_bytes=32 * 1024 * 1024,   # safe on v5e/v6e/v7x
        ),
        cost_estimate=cost,
        input_output_aliases=({1: 0} if donate_x else {}),
    )(mask, x)


if __name__ == "__main__":
    B, T, H = 2, 8, 128
    p = 0.5

    root = jax.random.PRNGKey(0)
    data_key, drop_key = jax.random.split(root)
    x = jax.random.normal(data_key, (B, T, H), dtype=jnp.float32)

    y = locked_dropout(x, p=p, key=drop_key, training=True)
    y = jax.block_until_ready(y)

    # Sanity checks of LockedDropout semantics:
    # 1) shape/dtype preserved
    assert y.shape == x.shape and y.dtype == x.dtype
    # 2) each output element is either 0 or x / (1 - p)   (exact: scale is 2.0)
    scaled = (x.astype(jnp.float32) * (1.0 / (1.0 - p))).astype(y.dtype)
    is_zero = (y == 0.0)
    is_scaled = (y == scaled)
    assert bool(jnp.all(is_zero | is_scaled))
    # 3) mask is locked across axis 1 (same columns dropped for every t)
    assert bool(jnp.all(is_zero == is_zero[:, :1, :]))
    # 4) eval mode / p == 0 is identity
    assert bool(jnp.all(locked_dropout(x, p=p, training=False) == x))
    assert bool(jnp.all(locked_dropout(x, p=0.0, key=drop_key, training=True) == x))

    print("KERNEL_OK")
</pallas_src>

<mosaic_0001>
module attributes {stable_mosaic.version = 11 : i64} {
  func.func @_locked_dropout_kernel(%arg0: i32, %arg1: i32, %arg2: memref<2x1x128xf32, #tpu.memory_space<vmem>>, %arg3: memref<2x8x128xf32, #tpu.memory_space<vmem>>, %arg4: memref<2x8x128xf32, #tpu.memory_space<vmem>>) attributes {dimension_semantics = [#tpu.dimension_semantics<parallel>, #tpu.dimension_semantics<parallel>], iteration_bounds = array<i64: 1, 1>, scalar_prefetch = 0 : i64, scratch_operands = 0 : i64, tpu.core_type = #tpu.core_type<tc>, window_params = [{transform_indices = @transform_0, window_bounds = array<i64: 2, 1, 128>}, {transform_indices = @transform_1, window_bounds = array<i64: 2, 8, 128>}, {transform_indices = @transform_2, window_bounds = array<i64: 2, 8, 128>}]} {
    %c0 = arith.constant 0 : index
    %c0_0 = arith.constant 0 : index
    %c0_1 = arith.constant 0 : index
    %0 = vector.load %arg3[%c0, %c0_0, %c0_1] : memref<2x8x128xf32, #tpu.memory_space<vmem>>, vector<2x8x128xf32>
    %c0_2 = arith.constant 0 : index
    %c0_3 = arith.constant 0 : index
    %c0_4 = arith.constant 0 : index
    %1 = vector.load %arg2[%c0_2, %c0_3, %c0_4] : memref<2x1x128xf32, #tpu.memory_space<vmem>>, vector<2x1x128xf32>
    %2 = vector.broadcast %1 : vector<2x1x128xf32> to vector<2x8x128xf32>
    %3 = arith.mulf %0, %2 : vector<2x8x128xf32>
    %c0_5 = arith.constant 0 : index
    %c0_6 = arith.constant 0 : index
    %c0_7 = arith.constant 0 : index
    %4 = vector.load %arg4[%c0_5, %c0_6, %c0_7] : memref<2x8x128xf32, #tpu.memory_space<vmem>>, vector<2x8x128xf32>
    tpu.vector_store %arg4[%c0_5, %c0_6, %c0_7], %3 {strides = array<i32>} : memref<2x8x128xf32, #tpu.memory_space<vmem>>, vector<2x8x128xf32>,
    return
  }
  func.func @transform_0(%arg0: i32, %arg1: i32) -> (i32, i32, i32) {
    %c0_i32 = arith.constant 0 : i32
    %c0_i32_0 = arith.constant 0 : i32
    %c0_i32_1 = arith.constant 0 : i32
    return %arg0, %c0_i32, %c0_i32_0 : i32, i32, i32
  }
  func.func @transform_1(%arg0: i32, %arg1: i32) -> (i32, i32, i32) {
    %c0_i32 = arith.constant 0 : i32
    %c0_i32_0 = arith.constant 0 : i32
    return %arg0, %arg1, %c0_i32 : i32, i32, i32
  }
  func.func @transform_2(%arg0: i32, %arg1: i32) -> (i32, i32, i32) {
    %c0_i32 = arith.constant 0 : i32
    %c0_i32_0 = arith.constant 0 : i32
    return %arg0, %arg1, %c0_i32 : i32, i32, i32
  }
}

</mosaic_0001>

<bundles_post_ra>
// kernel: tpu_custom_call.1
= control target key start
LH: loop header
LB: loop body
LE: loop exit
PB: predicated region body
PF: predicated region fallthrough
CT: control target
= control target key end

     0   :  { %7 = vsyncpa [#allocation3], 0  ;;  %s223_s0 = inlined_call_operand.hbm [shape: f32[2,1,128], index: 0, kind: input, shape index: {}]   ;;  %s224_s1 = inlined_call_operand.hbm [shape: f32[2,8,128], index: 1, kind: input, shape index: {}]   ;;  %s225_s2 = inlined_call_operand.hbm [shape: f32[2,8,128], index: 2, kind: output, shape index: {}]  }
   0x1   :  { %8 = vsyncpa [#allocation6], 0 }
   0x2   :  { %9 = vsyncpa [#allocation4], 0  ;;  %s159_s9 = smov [#allocation2]   ;;  %s87_s13 = scalar_lea.hbm %s223_s0, 32 }
   0x3   :  { %s15_s10 = sshll.u32 %s159_s9, 4  ;;  %p88_p0 = scmp.ne.s32.totalorder %s223_s0, %s87_s13  ;;  %s16_s10 = int_to_ptr.vmem [resolvable:$true] %s15_s10 }
   0x4   :  { %p91_p1 = scmp.lt.u32.totalorder %s87_s13, %s223_s0 }
   0x6   :  { %p93_p2 = pnand %p91_p1, %p88_p0 }
   0x8   :  { %96 = shalt.err (!%p93_p2)
}
   0x9   :  { %s97_s18 = scalar_lea.vmem %s16_s10, 32  ;;  %p102_p4 = scmp.lt.s32.totalorder %s16_s10, %s16_s10 }
   0xa   :  { %p98_p3 = scmp.ne.s32.totalorder %s16_s10, %s97_s18  ;;  %p103_p5 = scmp.lt.s32.totalorder %s97_s18, %s97_s18 }
   0xc   :  { %p104_p6 = por %p103_p5, %p102_p4 }
   0xe   :  { %p105_p7 = pnand %p104_p6, %p98_p3 }
  0x10   :  { %108 = shalt.err (!%p105_p7)
}
  0x11   :  { %s160_s19 = smov 16   ;;  %s161_s20 = smov 1  }
  0x12   :  { %21 = dma.hbm_to_vmem [thread:$0]  %s223_s0, 32, %s16_s10, [#allocation3], %s160_s19, %s160_s19, %s161_s20  }
  0x13   :  { %s162_s23 = smov [#allocation5]   ;;  %s109_s27 = scalar_lea.hbm %s224_s1, 256 }
  0x14   :  { %s27_s24 = sshll.u32 %s162_s23, 4  ;;  %p110_p8 = scmp.ne.s32.totalorder %s224_s1, %s109_s27  ;;  %s28_s24 = int_to_ptr.vmem [resolvable:$true] %s27_s24 }
  0x15   :  { %p113_p9 = scmp.lt.u32.totalorder %s109_s27, %s224_s1 }
  0x17   :  { %p115_p10 = pnand %p113_p9, %p110_p8 }
  0x19   :  { %118 = shalt.err (!%p115_p10)
}
  0x1a   :  { %s119_s4 = scalar_lea.vmem %s28_s24, 256  ;;  %p124_p12 = scmp.lt.s32.totalorder %s28_s24, %s28_s24 }
  0x1b   :  { %p120_p11 = scmp.ne.s32.totalorder %s28_s24, %s119_s4  ;;  %p125_p13 = scmp.lt.s32.totalorder %s119_s4, %s119_s4 }
  0x1d   :  { %p126_p0 = por %p125_p13, %p124_p12 }
  0x1f   :  { %p127_p1 = pnand %p126_p0, %p120_p11 }
  0x21   :  { %130 = shalt.err (!%p127_p1)
}
  0x22   :  { %s163_s0 = smov 128   ;;  %s164_s5 = smov 8  }
  0x23   :  { %33 = dma.hbm_to_vmem [thread:$0]  %s224_s1, 256, %s28_s24, [#allocation6], %s163_s0, %s163_s0, %s164_s5  }
  0x24   :  { %153 = dma.done.wait [#allocation3], 32  }
  0x25   :  { %154 = vsyncadd [#allocation3], 4294967264 }
  0x26   :  { %155 = dma.done.wait [#allocation6], 256  }
  0x27   :  { %156 = vsyncadd [#allocation6], 4294967040  ;;  %s165_s8 = smov [#allocation7]   ;;  %v40_v0 = vld [vmem:[#allocation5] sm:$0xff]  ;;  %v78_v1 = vld [vmem:[#allocation2] ss:$0 sm:$0xff] }
  0x28   :  { %s65_s9 = sshll.u32 %s165_s8, 4  ;;  %v41_v2 = vld [vmem:[#allocation5 + $0x8] sm:$0xff]  ;;  %v56_v3 = vmul.f32 %v78_v1, %v40_v0  ;;  %v79_v4 = vld [vmem:[#allocation2 + $0x1] ss:$0 sm:$0xff]  ;;  %s66_s9 = int_to_ptr.vmem [resolvable:$true] %s65_s9 }
  0x29   :  { %v57_v5 = vmul.f32 %v79_v4, %v41_v2  ;;  %s131_s10 = scalar_lea.vmem %s66_s9, 256  ;;  %p136_p3 = scmp.lt.s32.totalorder %s66_s9, %s66_s9 }
  0x2a   :  { %58 = vst [vmem:[#allocation7] sm:$0xff] %v56_v3  ;;  %p132_p2 = scmp.ne.s32.totalorder %s66_s9, %s131_s10  ;;  %p137_p4 = scmp.lt.s32.totalorder %s131_s10, %s131_s10 }
  0x2b   :  { %59 = vst [vmem:[#allocation7 + $0x8] sm:$0xff] %v57_v5 }
  0x2c   :  { %p138_p5 = por %p137_p4, %p136_p3 }
  0x2e   :  { %p139_p6 = pnand %p138_p5, %p132_p2 }
  0x30   :  { %142 = shalt.err (!%p139_p6)
}
  0x31   :  { %s143_s12 = scalar_lea.hbm %s225_s2, 256 }
  0x32   :  { %p144_p7 = scmp.ne.s32.totalorder %s225_s2, %s143_s12  ;;  %p147_p8 = scmp.lt.u32.totalorder %s143_s12, %s225_s2 }
  0x34   :  { %p149_p9 = pnand %p147_p8, %p144_p7 }
  0x36   :  { %152 = shalt.err (!%p149_p9)
}
  0x37   :  { %71 = dma.vmem_to_hbm [thread:$0]  %s66_s9, 256, %s225_s2, [#allocation4], %s163_s0, %s163_s0, %s164_s5  }
  0x38   :  { %157 = dma.done.wait [#allocation4], 256  }
  0x39   :  { %158 = vsyncadd [#allocation4], 4294967040 }
  0x3a   :  { %75 = vsyncpa [#allocation3], 1 }
  0x3b   :  { %76 = vsyncpa [#allocation6], 1 }
  0x3c   :  { %77 = vsyncpa [#allocation4], 1 }

</bundles_post_ra>
